<compile_context>
chip_gen: v7x
topology: tpu7x:2x2x1
jax: 0.10.0
libtpu: 0.0.40
codegen_flags: <defaults>
</compile_context>

<pallas_src>
import functools

import jax
import jax.numpy as jnp
import numpy as np
from jax import lax
from jax.experimental import pallas as pl
from jax.experimental.pallas import tpu as pltpu

# Plain Python float so it is baked into the jaxpr as a literal.
NEG_PAD = float(-2.0 ** 32 + 1)


def attention2_kernel(x_ref, w_ref, b_ref, avg_ref, o_ref, *, matmul_dtype):
    # x_ref  : [B, T, L]  block of packed batch groups (L = LP*C lanes)
    # w_ref  : [L, L]     block-diagonal nn.Linear weight, [out, in] layout
    # b_ref  : [1, L]     tiled bias
    # avg_ref: [L, L]     block-diagonal (1/C) segmented-averaging matrix
    b_blk, t, l = x_ref.shape
    rows = b_blk * t

    x3 = x_ref[...]                               # [B, T, L] f32
    x = x3.reshape(rows, l)                       # leading-dim collapse
    w = w_ref[...]
    b = b_ref[...]
    avg = avg_ref[...]

    # 1. Linear (x @ W^T via trans_b contraction) + Tanh; f32 MXU accumulation.
    #    matmul_dtype=bf16 halves MXU passes / operand traffic at large C.
    pre = lax.dot_general(
        x.astype(matmul_dtype), w.astype(matmul_dtype),
        dimension_numbers=(((1,), (1,)), ((), ())),
        preferred_element_type=jnp.float32,
    ) + b                                         # [rows, L]
    # TODO(synk): on v6e/v7x (bf16 EUP) evaluate bf16 inputs to tanh/exp.
    wt = jnp.tanh(pre)

    # 2. padding mask: segmented mean of |x| over each C-wide lane group,
    #    broadcast back across the group by the same block-diagonal matmul.
    seg_abs = jnp.dot(jnp.abs(x), avg, preferred_element_type=jnp.float32)
    wt = jnp.where(seg_abs > 0.0, wt, NEG_PAD)

    # 3. softmax over T (sublane axis of the [B, T, L] tile).
    wt3 = wt.reshape(b_blk, t, l)
    m = jnp.max(wt3, axis=1, keepdims=True)       # [B, 1, L]
    e = jnp.exp(wt3 - m)
    s = jnp.sum(e, axis=1, keepdims=True)         # [B, 1, L]
    r = pl.reciprocal(s, approx=True)             # EUP vrcp slot
    r = r * (2.0 - s * r)                         # one Newton step -> near-exact
    sm = e * r                                    # [B, T, L]

    # 4+5. mean over C within each packed segment (and broadcast back per lane)
    #      via one MXU matmul, then weight the original features.
    # TODO(synk): for C >= 128 (no packing) a lane-axis XLU reduction would
    # avoid this extra matmul.
    mw = jnp.dot(sm.reshape(rows, l), avg,
                 preferred_element_type=jnp.float32).reshape(b_blk, t, l)
    o_ref[...] = (mw * x3).astype(o_ref.dtype)


def _tpu_params():
    """Generation-aware (vmem_limit_bytes, tensorcores_per_chip, block_budget)."""
    kind = ""
    try:
        kind = jax.devices()[0].device_kind.lower()
    except Exception:
        pass
    vmem_cap = None
    try:
        vmem_cap = int(getattr(pltpu.get_tpu_info(), "vmem_capacity_bytes", 0)) or None
    except Exception:
        vmem_cap = None
    if vmem_cap is None:
        # v7x: 64 MiB VMEM per TensorCore; v5e/v6e: 128 MiB.
        vmem_cap = (64 << 20) if "v7" in kind else (128 << 20)
    # v7x has 2 TensorCores per chip; v5e/v6e have 1.
    num_tc = 2 if "v7" in kind else 1
    if vmem_cap <= (64 << 20):
        vmem_limit = 36 << 20     # v7x: stay well below 64 MiB physical
    else:
        vmem_limit = 64 << 20     # v5e/v6e: half of the 128 MiB physical
    # Budget the block picker may spend on the activation pipeline (headroom
    # left for resident weight/bias/avg buffers and Mosaic internal scratch).
    block_budget = vmem_limit - (8 << 20)
    return vmem_limit, num_tc, block_budget


def _pick_batch_block(n_groups, t, lane_dim, num_tc, budget_bytes, target_rows=2048):
    """Packed-batch groups per grid step.

    Accounts for (8,128) layout padding and ~6 live f32 block-sized temps on
    top of the 2x-in / 2x-out pipeline buffers, targets ~target_rows matmul
    rows per step (amortizes ~0.35us/step overhead), and only reserves grid
    steps for a second TensorCore when one exists.
    """
    t_pad = -(-t // 8) * 8
    l_pad = -(-lane_dim // 128) * 128
    bytes_per_group = t_pad * l_pad * 4
    live_blocks = 2 + 2 + 6        # in x2, out x2, live f32 intermediates
    max_by_vmem = max(1, budget_bytes // (live_blocks * bytes_per_group))
    want = max(1, -(-target_rows // t))
    blk = max(1, min(n_groups, want, max_by_vmem))
    if num_tc >= 2 and n_groups >= num_tc:
        blk = min(blk, max(1, n_groups // num_tc))
    return blk


def attention2(features, weight, bias, *, batch_block=None, matmul_dtype=None,
               interpret=False):
    """features: [N, T, C] f32; weight: [C, C] (nn.Linear [out, in]); bias: [C]."""
    n, t, c = features.shape
    dtype = features.dtype

    # Lane-packing factor: LP batch elements side-by-side on the 128 lanes.
    lp = max(1, 128 // c) if c < 128 else 1
    lane_dim = lp * c

    vmem_limit, num_tc, block_budget = _tpu_params()

    n_groups = -(-n // lp)
    if batch_block is None:
        batch_block = _pick_batch_block(n_groups, t, lane_dim, num_tc, block_budget)
    # Pad the batch so the grid is a whole number of blocks and, on multi-core
    # chips, a multiple of the TensorCore count (clean 2-way split on v7x).
    granularity = batch_block * (num_tc if (num_tc >= 2 and n_groups >= num_tc) else 1)
    n_groups_pad = -(-n_groups // granularity) * granularity
    n_pad = n_groups_pad * lp

    if n_pad != n:
        # zero rows are neutralized by the sign(sum|x|) mask -> zero output
        features = jnp.pad(features, ((0, n_pad - n), (0, 0), (0, 0)))

    # [N, T, C] -> [N/LP, T, LP*C]: lane-dense packed layout (wrapper-side
    # layout plumbing; the kernel sees full 128-wide vregs).
    x_packed = features.reshape(n_groups_pad, lp, t, c)
    x_packed = jnp.transpose(x_packed, (0, 2, 1, 3)).reshape(n_groups_pad, t, lane_dim)

    # Block-diagonal weight (LP copies of W), tiled bias, and block-diagonal
    # (1/C) averaging matrix (padding mask + mean-over-C + lane broadcast).
    eye = jnp.eye(lp, dtype=dtype)
    w_big = jnp.kron(eye, weight.astype(dtype))                     # [L, L]
    b_big = jnp.tile(bias.astype(dtype), lp).reshape(1, lane_dim)   # [1, L]
    avg = jnp.kron(eye, jnp.full((c, c), 1.0 / c, dtype=dtype))     # [L, L]

    if matmul_dtype is None:
        # bf16 MXU operands only once C is large enough to matter; keeps
        # small-C numerics tight (accumulation is f32 either way).
        matmul_dtype = jnp.bfloat16 if c >= 256 else dtype
    # TODO(synk): optionally move features through HBM as bf16 (halves traffic
    # on v5e/v6e) if the surrounding model tolerates a bf16 output dtype.

    # Single-buffer the resident (constant-index) weight/avg blocks once the
    # 2x double-buffer reservation is big enough to matter.
    const_kwargs = {}
    if lane_dim * lane_dim * 4 >= (1 << 20):
        const_kwargs = dict(pipeline_mode=pl.Buffered(1))
    w_spec = pl.BlockSpec((lane_dim, lane_dim), lambda i: (0, 0), **const_kwargs)
    avg_spec = pl.BlockSpec((lane_dim, lane_dim), lambda i: (0, 0), **const_kwargs)

    grid = (n_groups_pad // batch_block,)

    out_packed = pl.pallas_call(
        functools.partial(attention2_kernel, matmul_dtype=matmul_dtype),
        out_shape=jax.ShapeDtypeStruct((n_groups_pad, t, lane_dim), dtype),
        grid_spec=pltpu.PrefetchScalarGridSpec(
            num_scalar_prefetch=0,
            grid=grid,
            in_specs=[
                pl.BlockSpec((batch_block, t, lane_dim), lambda i: (i, 0, 0)),
                w_spec,
                pl.BlockSpec((1, lane_dim), lambda i: (0, 0)),
                avg_spec,
            ],
            out_specs=pl.BlockSpec((batch_block, t, lane_dim), lambda i: (i, 0, 0)),
        ),
        compiler_params=pltpu.CompilerParams(
            dimension_semantics=("parallel",),
            vmem_limit_bytes=vmem_limit,
        ),
        interpret=interpret,
    )(x_packed, w_big, b_big, avg)

    # Unpack [N/LP, T, LP*C] -> [N, T, C] and drop the batch padding.
    out = out_packed.reshape(n_groups_pad, t, lp, c)
    out = jnp.transpose(out, (0, 2, 1, 3)).reshape(n_pad, t, c)
    return out[:n]


def attention2_ref(features, weight, bias):
    """Pure-JAX reference mirroring the PyTorch forward (mean=True)."""
    n, t, c = features.shape
    wt = jnp.tanh(features @ weight.T + bias)                       # [N,T,C]
    mask = jnp.sign(jnp.sum(jnp.abs(features), axis=-1))[:, :, None]
    wt = jnp.where(mask == 1.0, wt, NEG_PAD)
    wt = jnp.transpose(wt, (0, 2, 1))                               # [N,C,T]
    wt = jax.nn.softmax(wt, axis=2)
    mw = jnp.mean(wt, axis=1)[:, None, :]                           # [N,1,T]
    mw = jnp.broadcast_to(mw, (n, c, t))
    mw = jnp.transpose(mw, (0, 2, 1))                               # [N,T,C]
    return mw * features


if __name__ == "__main__":
    N, T, C = 8, 8, 32  # batch, time_step, hidden_dim

    key = jax.random.PRNGKey(0)
    k_x, k_w, k_b = jax.random.split(key, 3)

    features = jax.random.normal(k_x, (N, T, C), dtype=jnp.float32)
    # zero out some timesteps to exercise the padding-mask path
    features = features.at[0, 3, :].set(0.0)
    features = features.at[5, 0, :].set(0.0)

    # deterministic nn.Linear(hidden_dim, hidden_dim) parameters
    weight = jax.random.normal(k_w, (C, C), dtype=jnp.float32) * (1.0 / jnp.sqrt(C))
    bias = jax.random.normal(k_b, (C,), dtype=jnp.float32) * 0.1

    out = jax.block_until_ready(attention2(features, weight, bias))
    ref = attention2_ref(features, weight, bias)
    np.testing.assert_allclose(np.asarray(out), np.asarray(ref), rtol=2e-3, atol=2e-3)

    # awkward batch size exercises the N-padding path (padded rows mask to 0)
    feats2 = jax.random.normal(jax.random.PRNGKey(1), (5, T, C), dtype=jnp.float32)
    feats2 = feats2.at[2, 1, :].set(0.0)
    out2 = jax.block_until_ready(attention2(feats2, weight, bias))
    ref2 = attention2_ref(feats2, weight, bias)
    np.testing.assert_allclose(np.asarray(out2), np.asarray(ref2), rtol=2e-3, atol=2e-3)

    print("KERNEL_OK")
</pallas_src>

<mosaic_0001>
module attributes {stable_mosaic.version = 11 : i64} {
  func.func @attention2_kernel(%arg0: i32, %arg1: memref<2x8x128xf32, #tpu.memory_space<vmem>>, %arg2: memref<128x128xf32, #tpu.memory_space<vmem>>, %arg3: memref<1x128xf32, #tpu.memory_space<vmem>>, %arg4: memref<128x128xf32, #tpu.memory_space<vmem>>, %arg5: memref<2x8x128xf32, #tpu.memory_space<vmem>>) attributes {dimension_semantics = [#tpu.dimension_semantics<parallel>], iteration_bounds = array<i64: 1>, scalar_prefetch = 0 : i64, scratch_operands = 0 : i64, tpu.core_type = #tpu.core_type<tc>, window_params = [{transform_indices = @transform_0, window_bounds = array<i64: 2, 8, 128>}, {pipeline_mode = #tpu.pipeline_mode<synchronous>, transform_indices = @transform_1, window_bounds = array<i64: 128, 128>}, {pipeline_mode = #tpu.pipeline_mode<synchronous>, transform_indices = @transform_2, window_bounds = array<i64: 1, 128>}, {pipeline_mode = #tpu.pipeline_mode<synchronous>, transform_indices = @transform_3, window_bounds = array<i64: 128, 128>}, {transform_indices = @transform_4, window_bounds = array<i64: 2, 8, 128>}]} {
    %c0 = arith.constant 0 : index
    %c0_0 = arith.constant 0 : index
    %c0_1 = arith.constant 0 : index
    %0 = vector.load %arg1[%c0, %c0_0, %c0_1] : memref<2x8x128xf32, #tpu.memory_space<vmem>>, vector<2x8x128xf32>
    %1 = vector.shape_cast %0 : vector<2x8x128xf32> to vector<16x128xf32>
    %c0_2 = arith.constant 0 : index
    %c0_3 = arith.constant 0 : index
    %2 = vector.load %arg2[%c0_2, %c0_3] : memref<128x128xf32, #tpu.memory_space<vmem>>, vector<128x128xf32>
    %c0_4 = arith.constant 0 : index
    %c0_5 = arith.constant 0 : index
    %3 = vector.load %arg3[%c0_4, %c0_5] : memref<1x128xf32, #tpu.memory_space<vmem>>, vector<1x128xf32>
    %c0_6 = arith.constant 0 : index
    %c0_7 = arith.constant 0 : index
    %4 = vector.load %arg4[%c0_6, %c0_7] : memref<128x128xf32, #tpu.memory_space<vmem>>, vector<128x128xf32>
    %cst = arith.constant dense<0.000000e+00> : vector<16x128xf32>
    %5 = tpu.matmul %1, %2, %cst {dimension_numbers = #tpu.dot_dimension_numbers<[1], [1], [0], [0], [0, 0, 1, 0], [], []>} : vector<16x128xf32>, vector<128x128xf32>, vector<16x128xf32> -> vector<16x128xf32>
    %6 = vector.broadcast %3 : vector<1x128xf32> to vector<16x128xf32>
    %7 = arith.addf %5, %6 : vector<16x128xf32>
    %8 = math.tanh %7 : vector<16x128xf32>
    %9 = math.absf %1 : vector<16x128xf32>
    %cst_8 = arith.constant dense<0.000000e+00> : vector<16x128xf32>
    %10 = tpu.matmul %9, %4, %cst_8 {dimension_numbers = #tpu.dot_dimension_numbers<[1], [0], [0], [1], [0, 0, 1, 1], [], []>} : vector<16x128xf32>, vector<128x128xf32>, vector<16x128xf32> -> vector<16x128xf32>
    %cst_9 = arith.constant 0.000000e+00 : f32
    %11 = vector.broadcast %cst_9 : f32 to vector<16x128xf32>
    %12 = arith.cmpf ogt, %10, %11 : vector<16x128xf32>
    %cst_10 = arith.constant -4.2949673E+9 : f32
    %13 = vector.broadcast %cst_10 : f32 to vector<16x128xf32>
    %14 = arith.select %12, %8, %13 : vector<16x128xi1>, vector<16x128xf32>
    %15 = vector.shape_cast %14 : vector<16x128xf32> to vector<2x8x128xf32>
    %cst_11 = arith.constant dense<0xFF800000> : vector<2x128xf32>
    %16 = vector.multi_reduction <maximumf>, %15, %cst_11 [1] : vector<2x8x128xf32> to vector<2x128xf32>
    %17 = vector.shape_cast %16 : vector<2x128xf32> to vector<2x1x128xf32>
    %18 = vector.broadcast %17 : vector<2x1x128xf32> to vector<2x8x128xf32>
    %19 = arith.subf %15, %18 : vector<2x8x128xf32>
    %20 = math.exp %19 : vector<2x8x128xf32>
    %cst_12 = arith.constant dense<0.000000e+00> : vector<2x128xf32>
    %21 = vector.multi_reduction <add>, %20, %cst_12 [1] : vector<2x8x128xf32> to vector<2x128xf32>
    %22 = vector.shape_cast %21 : vector<2x128xf32> to vector<2x1x128xf32>
    %23 = tpu.reciprocal %22 {approx = true} : vector<2x1x128xf32> -> vector<2x1x128xf32>
    %24 = arith.mulf %22, %23 : vector<2x1x128xf32>
    %cst_13 = arith.constant 2.000000e+00 : f32
    %25 = vector.broadcast %cst_13 : f32 to vector<2x1x128xf32>
    %26 = arith.subf %25, %24 : vector<2x1x128xf32>
    %27 = arith.mulf %23, %26 : vector<2x1x128xf32>
    %28 = vector.broadcast %27 : vector<2x1x128xf32> to vector<2x8x128xf32>
    %29 = arith.mulf %20, %28 : vector<2x8x128xf32>
    %30 = vector.shape_cast %29 : vector<2x8x128xf32> to vector<16x128xf32>
    %cst_14 = arith.constant dense<0.000000e+00> : vector<16x128xf32>
    %31 = tpu.matmul %30, %4, %cst_14 {dimension_numbers = #tpu.dot_dimension_numbers<[1], [0], [0], [1], [0, 0, 1, 1], [], []>} : vector<16x128xf32>, vector<128x128xf32>, vector<16x128xf32> -> vector<16x128xf32>
    %32 = vector.shape_cast %31 : vector<16x128xf32> to vector<2x8x128xf32>
    %33 = arith.mulf %32, %0 : vector<2x8x128xf32>
    %c0_15 = arith.constant 0 : index
    %c0_16 = arith.constant 0 : index
    %c0_17 = arith.constant 0 : index
    %34 = vector.load %arg5[%c0_15, %c0_16, %c0_17] : memref<2x8x128xf32, #tpu.memory_space<vmem>>, vector<2x8x128xf32>
    tpu.vector_store %arg5[%c0_15, %c0_16, %c0_17], %33 {strides = array<i32>} : memref<2x8x128xf32, #tpu.memory_space<vmem>>, vector<2x8x128xf32>,
    return
  }
  func.func @transform_0(%arg0: i32) -> (i32, i32, i32) {
    %c0_i32 = arith.constant 0 : i32
    %c0_i32_0 = arith.constant 0 : i32
    %c0_i32_1 = arith.constant 0 : i32
    return %arg0, %c0_i32, %c0_i32_0 : i32, i32, i32
  }
  func.func @transform_1(%arg0: i32) -> (i32, i32) {
    %c0_i32 = arith.constant 0 : i32
    %c0_i32_0 = arith.constant 0 : i32
    %c0_i32_1 = arith.constant 0 : i32
    return %c0_i32, %c0_i32_0 : i32, i32
  }
  func.func @transform_2(%arg0: i32) -> (i32, i32) {
    %c0_i32 = arith.constant 0 : i32
    %c0_i32_0 = arith.constant 0 : i32
    %c0_i32_1 = arith.constant 0 : i32
    return %c0_i32, %c0_i32_0 : i32, i32
  }
  func.func @transform_3(%arg0: i32) -> (i32, i32) {
    %c0_i32 = arith.constant 0 : i32
    %c0_i32_0 = arith.constant 0 : i32
    %c0_i32_1 = arith.constant 0 : i32
    return %c0_i32, %c0_i32_0 : i32, i32
  }
  func.func @transform_4(%arg0: i32) -> (i32, i32, i32) {
    %c0_i32 = arith.constant 0 : i32
    %c0_i32_0 = arith.constant 0 : i32
    %c0_i32_1 = arith.constant 0 : i32
    return %arg0, %c0_i32, %c0_i32_0 : i32, i32, i32
  }
}

</mosaic_0001>

<bundles_post_ra>
// kernel: tpu_custom_call.1
= control target key start
LH: loop header
LB: loop body
LE: loop exit
PB: predicated region body
PF: predicated region fallthrough
CT: control target
= control target key end

     0   :  { %9 = vsyncpa [#allocation3], 0  ;;  %s947_s0 = inlined_call_operand.hbm [shape: f32[2,8,128], index: 0, kind: input, shape index: {}]   ;;  %s948_s1 = inlined_call_operand.hbm [shape: f32[128,128], index: 1, kind: input, shape index: {}]   ;;  %s949_s2 = inlined_call_operand.hbm [shape: f32[1,128], index: 2, kind: input, shape index: {}]   ;;  %s950_s3 = inlined_call_operand.hbm [shape: f32[128,128], index: 3, kind: input, shape index: {}]   ;;  %s951_s4 = inlined_call_operand.hbm [shape: f32[2,8,128], index: 4, kind: output, shape index: {}]  }
   0x1   :  { %10 = vsyncpa [#allocation6], 0 }
   0x2   :  { %11 = vsyncpa [#allocation9], 0 }
   0x3   :  { %12 = vsyncpa [#allocation4], 0  ;;  %s801_s15 = smov [#allocation5]   ;;  %s802_s17 = smov [#allocation2]  }
   0x4   :  { %s30_s16 = sshll.u32 %s801_s15, 4  ;;  %s18_s18 = sshll.u32 %s802_s17, 4  ;;  %s31_s16 = int_to_ptr.vmem [resolvable:$true] %s30_s16  ;;  %s833_s18 = int_to_ptr.vmem [resolvable:$true] %s18_s18 }
   0x5   :  { %s683_s21 = scalar_lea.hbm %s948_s1, 2048 }
   0x6   :  { %p684_p0 = scmp.ne.s32.totalorder %s948_s1, %s683_s21  ;;  %p687_p1 = scmp.lt.u32.totalorder %s683_s21, %s948_s1 }
   0x8   :  { %p689_p2 = pnand %p687_p1, %p684_p0 }
   0xa   :  { %692 = shalt.err (!%p689_p2)
}
   0xb   :  { %s693_s26 = scalar_lea.vmem %s31_s16, 2048  ;;  %p698_p4 = scmp.lt.s32.totalorder %s31_s16, %s31_s16 }
   0xc   :  { %p694_p3 = scmp.ne.s32.totalorder %s31_s16, %s693_s26  ;;  %p699_p5 = scmp.lt.s32.totalorder %s693_s26, %s693_s26 }
   0xe   :  { %p700_p6 = por %p699_p5, %p698_p4 }
  0x10   :  { %p701_p7 = pnand %p700_p6, %p694_p3 }
  0x12   :  { %704 = shalt.err (!%p701_p7)
}
  0x13   :  { %s803_s27 = smov 128   ;;  %s804_s28 = smov 8  }
  0x14   :  { %36 = dma.hbm_to_vmem [thread:$0]  %s948_s1, 2048, %s31_s16, [#allocation6], %s803_s27, %s803_s27, %s804_s28  }
  0x15   :  { %s705_s7 = scalar_lea.hbm %s947_s0, 256 }
  0x16   :  { %p706_p8 = scmp.ne.s32.totalorder %s947_s0, %s705_s7  ;;  %p709_p9 = scmp.lt.u32.totalorder %s705_s7, %s947_s0 }
  0x18   :  { %p711_p10 = pnand %p709_p9, %p706_p8 }
  0x1a   :  { %714 = shalt.err (!%p711_p10)
}
  0x1b   :  { %s715_s12 = scalar_lea.vmem %s833_s18, 256  ;;  %p720_p12 = scmp.lt.s32.totalorder %s833_s18, %s833_s18 }
  0x1c   :  { %p716_p11 = scmp.ne.s32.totalorder %s833_s18, %s715_s12  ;;  %p721_p13 = scmp.lt.s32.totalorder %s715_s12, %s715_s12 }
  0x1e   :  { %p722_p0 = por %p721_p13, %p720_p12 }
  0x20   :  { %p723_p1 = pnand %p722_p0, %p716_p11 }
  0x22   :  { %726 = shalt.err (!%p723_p1)
}
  0x23   :  { %24 = dma.hbm_to_vmem [thread:$0]  %s947_s0, 256, %s833_s18, [#allocation3], %s803_s27, %s803_s27, %s804_s28  }
  0x24   :  { %s805_s14 = smov [#allocation7]   ;;  %s806_s16 = smov [#allocation8]  }
  0x25   :  { %s43_s15 = sshll.u32 %s805_s14, 4  ;;  %s52_s17 = sshll.u32 %s806_s16, 4  ;;  %s44_s15 = int_to_ptr.vmem [resolvable:$true] %s43_s15  ;;  %s870_s17 = int_to_ptr.vmem [resolvable:$true] %s52_s17 }
  0x26   :  { %s727_s21 = scalar_lea.hbm %s949_s2, 16 }
  0x27   :  { %p728_p2 = scmp.ne.s32.totalorder %s949_s2, %s727_s21  ;;  %p731_p3 = scmp.lt.u32.totalorder %s727_s21, %s949_s2 }
  0x29   :  { %p733_p4 = pnand %p731_p3, %p728_p2 }
  0x2b   :  { %736 = shalt.err (!%p733_p4)
}
  0x2c   :  { %s737_s0 = scalar_lea.vmem %s44_s15, 16  ;;  %s741_s18 = scalar_lea.vmem %s44_s15, 32 }
  0x2d   :  { %p738_p5 = scmp.ne.s32.totalorder %s44_s15, %s737_s0  ;;  %p742_p6 = scmp.lt.s32.totalorder %s44_s15, %s44_s15 }
  0x2e   :  { %p743_p7 = scmp.lt.s32.totalorder %s741_s18, %s737_s0 }
  0x30   :  { %p744_p8 = por %p743_p7, %p742_p6 }
  0x32   :  { %p745_p9 = pnand %p744_p8, %p738_p5 }
  0x34   :  { %748 = shalt.err (!%p745_p9)
}
  0x35   :  { %46 = dma.hbm_to_vmem [thread:$0]  %s949_s2, 16, %s44_s15, [#allocation6]  }
  0x36   :  { %s749_s6 = scalar_lea.hbm %s950_s3, 2048 }
  0x37   :  { %p750_p10 = scmp.ne.s32.totalorder %s950_s3, %s749_s6  ;;  %p753_p11 = scmp.lt.u32.totalorder %s749_s6, %s950_s3 }
  0x39   :  { %p755_p12 = pnand %p753_p11, %p750_p10 }
  0x3b   :  { %758 = shalt.err (!%p755_p12)
}
  0x3c   :  { %s759_s11 = scalar_lea.vmem %s870_s17, 2048  ;;  %p764_p0 = scmp.lt.s32.totalorder %s870_s17, %s870_s17 }
  0x3d   :  { %p760_p13 = scmp.ne.s32.totalorder %s870_s17, %s759_s11  ;;  %p765_p1 = scmp.lt.s32.totalorder %s759_s11, %s759_s11 }
  0x3f   :  { %p766_p2 = por %p765_p1, %p764_p0 }
  0x41   :  { %p767_p3 = pnand %p766_p2, %p760_p13 }
  0x43   :  { %770 = shalt.err (!%p767_p3)
}
  0x44   :  { %58 = dma.hbm_to_vmem [thread:$0]  %s950_s3, 2048, %s870_s17, [#allocation9], %s803_s27, %s803_s27, %s804_s28  }
  0x45   :  { %793 = dma.done.wait [#allocation3], 256  }
  0x46   :  { %794 = vsyncadd [#allocation3], 4294967040 }
  0x47   :  { %795 = dma.done.wait [#allocation6], 2064  }
  0x48   :  { %796 = vsyncadd [#allocation6], 4294965232 }
  0x49   :  { %797 = dma.done.wait [#allocation9], 2048  }
  0x4a   :  { %798 = vsyncadd [#allocation9], 4294965248  ;;  %v73_v0 = vld [vmem:[#allocation5] sm:$0xff]  ;;  %v74_v1 = vld [vmem:[#allocation5 + $0x8] sm:$0xff]  ;;  %s807_s3 = smov [#allocation10]  }
  0x4b   :  { %v75_v2 = vld [vmem:[#allocation5 + $0x10] sm:$0xff]  ;;  %v568_v3 = vpack.c.bf16 %v74_v1, %v73_v0  ;;  %v76_v4 = vld [vmem:[#allocation5 + $0x18] sm:$0xff]  ;;  %v90_v6 = vld [vmem:[#allocation8] sm:$0xff]  ;;  %s394_s1 = sshll.u32 %s807_s3, 4  ;;  %s395_s1 = int_to_ptr.vmem [resolvable:$true] %s394_s1 }
  0x4c   :  { %v572_v5 = vpack.c.bf16 %v76_v4, %v75_v2  ;;  %v91_v7 = vld [vmem:[#allocation8 + $0x8] sm:$0xff]  ;;  %v92_v8 = vld [vmem:[#allocation8 + $0x10] sm:$0xff]  ;;  %v77_v9 = vld [vmem:[#allocation5 + $0x20] sm:$0xff]  ;;  %s771_s13 = scalar_lea.vmem %s395_s1, 256  ;;  %p776_p5 = scmp.lt.s32.totalorder %s395_s1, %s395_s1 }
  0x4d   :  { %569 = vmatprep.subr.bf16.mxu0 %v568_v3  ;;  %v904_v10 = vpack.c.bf16 %v91_v7, %v90_v6  ;;  %v93_v11 = vld [vmem:[#allocation8 + $0x18] sm:$0xff]  ;;  %v78_v12 = vld [vmem:[#allocation5 + $0x28] sm:$0xff]  ;;  %v910_v16 = vld [vmem:[#allocation2] sm:$0xff]  ;;  %p772_p4 = scmp.ne.s32.totalorder %s395_s1, %s771_s13  ;;  %p777_p6 = scmp.lt.s32.totalorder %s771_s13, %s771_s13 }
  0x4e   :  { %571 = vmatpush3.bf16.xpose.msra.mxu0 %v568_v3  ;;  %v906_v13 = vpack.c.bf16 %v93_v11, %v92_v8  ;;  %v94_v14 = vld [vmem:[#allocation8 + $0x20] sm:$0xff]  ;;  %v95_v15 = vld [vmem:[#allocation8 + $0x28] sm:$0xff]  ;;  %v576_v17 = vpack.c.bf16 %v78_v12, %v77_v9  ;;  %495 = vmatprep.mubr.f32.mxu0 %v910_v16  ;;  %v189_v19 = vand.u32 2147483647, %v910_v16  ;;  %v96_v20 = vld [vmem:[#allocation8 + $0x30] sm:$0xff] }
  0x4f   :  { %573 = vmatprep.subr.bf16.mxu0 %v572_v5  ;;  %601 = vmatprep.subr.bf16.mxu1 %v904_v10  ;;  %v913_v18 = vpack.c.bf16 %v95_v15, %v94_v14  ;;  %v97_v21 = vld [vmem:[#allocation8 + $0x38] sm:$0xff]  ;;  %v79_v22 = vld [vmem:[#allocation5 + $0x30] sm:$0xff]  ;;  %v98_v25 = vld [vmem:[#allocation8 + $0x40] sm:$0xff]  ;;  %p778_p7 = por %p777_p6, %p776_p5 }
  0x50   :  { %603 = vmatpush3.bf16.msra.mxu1 %v904_v10  ;;  %530 = vmatprep.mubr.f32.mxu1 %v189_v19  ;;  %v612_v23 = vpack.c.bf16 %v97_v21, %v96_v20  ;;  %v80_v24 = vld [vmem:[#allocation5 + $0x38] sm:$0xff]  ;;  %v99_v26 = vld [vmem:[#allocation8 + $0x48] sm:$0xff]  ;;  %v81_v31 = vld [vmem:[#allocation5 + $0x40] sm:$0xff] }
  0x51   :  { %605 = vmatprep.subr.bf16.mxu1 %v906_v13  ;;  %v580_v27 = vpack.c.bf16 %v80_v24, %v79_v22  ;;  %v616_v28 = vpack.c.bf16 %v99_v26, %v98_v25  ;;  %v100_v29 = vld [vmem:[#allocation8 + $0x50] sm:$0xff]  ;;  %v101_v30 = vld [vmem:[#allocation8 + $0x58] sm:$0xff]  ;;  %v82_v33 = vld [vmem:[#allocation5 + $0x48] sm:$0xff]  ;;  %p779_p8 = pnand %p778_p7, %p772_p4 }
  0x52   :  { %v620_v32 = vpack.c.bf16 %v101_v30, %v100_v29  ;;  %v102_v34 = vld [vmem:[#allocation8 + $0x60] sm:$0xff]  ;;  %v103_v35 = vld [vmem:[#allocation8 + $0x68] sm:$0xff]  ;;  %v584_v36 = vpack.c.bf16 %v82_v33, %v81_v31  ;;  %v104_v38 = vld [vmem:[#allocation8 + $0x70] sm:$0xff] }
  0x53   :  { %v624_v37 = vpack.c.bf16 %v103_v35, %v102_v34  ;;  %v105_v39 = vld [vmem:[#allocation8 + $0x78] sm:$0xff]  ;;  %v83_v41 = vld [vmem:[#allocation5 + $0x50] sm:$0xff]  ;;  %v86_v47 = vld [vmem:[#allocation5 + $0x68] sm:$0xff] }
  0x54   :  { %607 = vmatpush3.bf16.msra.mxu1 %v906_v13  ;;  %v628_v40 = vpack.c.bf16 %v105_v39, %v104_v38  ;;  %v84_v42 = vld [vmem:[#allocation5 + $0x58] sm:$0xff]  ;;  %v85_v46 = vld [vmem:[#allocation5 + $0x60] sm:$0xff]  ;;  %v87_v49 = vld [vmem:[#allocation5 + $0x70] sm:$0xff] }
  0x55   :  { %609 = vmatprep.subr.bf16.mxu1 %v913_v18  ;;  %v588_v43 = vpack.c.bf16 %v84_v42, %v83_v41  ;;  %v920_v44 = vld [vmem:[#allocation2 + $0x8] sm:$0xff]  ;;  %v592_v48 = vpack.c.bf16 %v86_v47, %v85_v46  ;;  %v408_v54 = vld [vmem:[#allocation7] ss:$0 sm:$0xff] }
  0x56   :  { %575 = vmatpush3.bf16.xpose.msra.mxu0 %v572_v5  ;;  %v190_v45 = vand.u32 2147483647, %v920_v44  ;;  %v88_v50 = vld [vmem:[#allocation5 + $0x78] sm:$0xff] }
  0x57   :  { %577 = vmatprep.subr.bf16.mxu0 %v576_v17  ;;  %v596_v51 = vpack.c.bf16 %v88_v50, %v87_v49 }
  0x58   :  { %611 = vmatpush3.bf16.msra.mxu1 %v913_v18 }
  0x59   :  { %613 = vmatprep.subr.bf16.mxu1 %v612_v23 }
  0x5c   :  { %615 = vmatpush3.bf16.msra.mxu1 %v612_v23 }
  0x5d   :  { %617 = vmatprep.subr.bf16.mxu1 %v616_v28 }
  0x5e   :  { %579 = vmatpush3.bf16.xpose.msra.mxu0 %v576_v17 }
  0x5f   :  { %581 = vmatprep.subr.bf16.mxu0 %v580_v27 }
  0x60   :  { %619 = vmatpush3.bf16.msra.mxu1 %v616_v28 }
  0x61   :  { %621 = vmatprep.subr.bf16.mxu1 %v620_v32 }
  0x64   :  { %623 = vmatpush3.bf16.msra.mxu1 %v620_v32 }
  0x65   :  { %625 = vmatprep.subr.bf16.mxu1 %v624_v37 }
  0x66   :  { %583 = vmatpush3.bf16.xpose.msra.mxu0 %v580_v27 }
  0x67   :  { %585 = vmatprep.subr.bf16.mxu0 %v584_v36 }
  0x68   :  { %627 = vmatpush3.bf16.msra.mxu1 %v624_v37 }
  0x69   :  { %629 = vmatprep.subr.bf16.mxu1 %v628_v40 }
  0x6c   :  { %631 = vmatpush3.bf16.msra.mxu1 %v628_v40 }
  0x6d   :  { %633 = vmatprep.subr.bf16.mxu1 %v904_v10 }
  0x6e   :  { %587 = vmatpush3.bf16.xpose.msra.mxu0 %v584_v36 }
  0x6f   :  { %589 = vmatprep.subr.bf16.mxu0 %v588_v43  ;;  %531 = vmatmul.mubr.f32.vlgmr.msra.gmra.mrb[0].mxu1 %v190_v45 }
  0x70   :  { %635 = vmatpush3.bf16.msra.mxu1 %v904_v10 }
  0x71   :  { %637 = vmatprep.subr.bf16.mxu1 %v906_v13 }
  0x74   :  { %639 = vmatpush3.bf16.msra.mxu1 %v906_v13 }
  0x75   :  { %641 = vmatprep.subr.bf16.mxu1 %v913_v18 }
  0x76   :  { %591 = vmatpush3.bf16.xpose.msra.mxu0 %v588_v43 }
  0x77   :  { %593 = vmatprep.subr.bf16.mxu0 %v592_v48 }
  0x78   :  { %643 = vmatpush3.bf16.msra.mxu1 %v913_v18 }
  0x79   :  { %645 = vmatprep.subr.bf16.mxu1 %v612_v23 }
  0x7c   :  { %647 = vmatpush3.bf16.msra.mxu1 %v612_v23 }
  0x7d   :  { %649 = vmatprep.subr.bf16.mxu1 %v616_v28 }
  0x7e   :  { %595 = vmatpush3.bf16.xpose.msra.mxu0 %v592_v48 }
  0x7f   :  { %597 = vmatprep.subr.bf16.mxu0 %v596_v51 }
  0x80   :  { %651 = vmatpush3.bf16.msra.mxu1 %v616_v28 }
  0x81   :  { %653 = vmatprep.subr.bf16.mxu1 %v620_v32 }
  0x84   :  { %655 = vmatpush3.bf16.msra.mxu1 %v620_v32 }
  0x85   :  { %657 = vmatprep.subr.bf16.mxu1 %v624_v37 }
  0x86   :  { %599 = vmatpush3.bf16.xpose.msra.mxu0 %v596_v51 }
  0x88   :  { %659 = vmatpush3.bf16.msra.mxu1 %v624_v37 }
  0x89   :  { %661 = vmatprep.subr.bf16.mxu1 %v628_v40 }
  0x8c   :  { %663 = vmatpush3.bf16.msra.mxu1 %v628_v40 }
  0x8d   :  { %496 = vmatmul.mubr.f32.vlgmr.msra.gmra.mrb[0].mxu0 %v920_v44 }
 0x142   :  { %v532_v52 = vpop.f32.mrb[0].mxu1 }
 0x143   :  { %v257_v53 = vpop.f32.mrb[1].mxu1  ;;  %vm267_vm0 = vcmp.gt.f32.partialorder %v532_v52, 0.0 }
 0x144   :  { %vm266_vm1 = vcmp.gt.f32.partialorder %v257_v53, 0.0 }
 0x160   :  { %v497_v55 = vpop.f32.mrb[0].mxu0 }
 0x161   :  { %v184_v56 = vadd.f32 %v497_v55, %v408_v54  ;;  %v178_v57 = vpop.f32.mrb[1].mxu0 }
 0x162   :  { %v179_v58 = vadd.f32 %v408_v54, %v178_v57 }
 0x163   :  { %671 = vtanh.f32 %v184_v56 }
 0x164   :  { %673 = vtanh.f32 %v179_v58 }
 0x16d   :  { %v672_v59 = vpop.eup %671 }
 0x16e   :  { %v674_v60 = vpop.eup %673  ;;  %v269_v61 = vsel %vm267_vm0, %v672_v59, -4.2949673e+09 }
 0x16f   :  { %v276_v62 = vrot.slane %v269_v61, 4  ;;  %v268_v63 = vsel %vm266_vm1, %v674_v60, -4.2949673e+09 }
 0x170   :  { %v270_v0 = vrot.slane %v268_v63, 4 }
 0x171   :  { %v277_v1 = vmax.f32 %v269_v61, %v276_v62 }
 0x172   :  { %v271_v2 = vmax.f32 %v268_v63, %v270_v0 }
 0x173   :  { %v278_v3 = vrot.slane %v277_v1, 2 }
 0x174   :  { %v272_v4 = vrot.slane %v271_v2, 2 }
 0x175   :  { %v279_v5 = vmax.f32 %v277_v1, %v278_v3 }
 0x176   :  { %v273_v6 = vmax.f32 %v271_v2, %v272_v4 }
 0x177   :  { %v280_v7 = vrot.slane %v279_v5, 1 }
 0x178   :  { %v274_v8 = vrot.slane %v273_v6, 1 }
 0x179   :  { %v281_v9 = vmax.f32 %v279_v5, %v280_v7 }
 0x17a   :  { %v275_v10 = vmax.f32 %v273_v6, %v274_v8 }
 0x17b   :  { %v283_v11 = vsub.f32 %v269_v61, %v281_v9 }
 0x17c   :  { %v282_v12 = vsub.f32 %v268_v63, %v275_v10 }
 0x17d   :  { %v286_v13 = vmul.f32 1.442695, %v283_v11 }
 0x17e   :  { %v284_v14 = vmul.f32 1.442695, %v282_v12 }
 0x17f   :  { %675 = vpow2.f32 %v286_v13 }
 0x180   :  { %677 = vpow2.f32 %v284_v14 }
 0x189   :  { %v676_v15 = vpop.eup %675 }
 0x18a   :  { %v678_v17 = vpop.eup %677  ;;  %v294_v18 = vrot.slane %v676_v15, 4 }
 0x18b   :  { %v288_v19 = vrot.slane %v678_v17, 4 }
 0x18c   :  { %v295_v20 = vadd.f32 %v676_v15, %v294_v18 }
 0x18d   :  { %v289_v21 = vadd.f32 %v678_v17, %v288_v19 }
 0x18e   :  { %v296_v22 = vrot.slane %v295_v20, 2 }
 0x18f   :  { %v290_v23 = vrot.slane %v289_v21, 2 }
 0x190   :  { %v297_v24 = vadd.f32 %v296_v22, %v295_v20 }
 0x191   :  { %v291_v25 = vadd.f32 %v290_v23, %v289_v21 }
 0x192   :  { %v298_v26 = vrot.slane %v297_v24, 1 }
 0x193   :  { %v292_v27 = vrot.slane %v291_v25, 1 }
 0x194   :  { %v299_v28 = vadd.f32 %v298_v26, %v297_v24 }
 0x195   :  { %v293_v29 = vadd.f32 %v292_v27, %v291_v25 }
 0x196   :  { %679 = vrcp.f32 %v299_v28 }
 0x197   :  { %681 = vrcp.f32 %v293_v29 }
 0x1a0   :  { %v680_v30 = vpop.eup %679 }
 0x1a1   :  { %v682_v31 = vpop.eup %681  ;;  %v303_v32 = vmul.f32 %v680_v30, %v299_v28 }
 0x1a2   :  { %v302_v33 = vmul.f32 %v682_v31, %v293_v29 }
 0x1a3   :  { %v305_v34 = vsub.f32 2.0, %v303_v32 }
 0x1a4   :  { %v304_v35 = vsub.f32 2.0, %v302_v33 }
 0x1a5   :  { %v307_v36 = vmul.f32 %v680_v30, %v305_v34 }
 0x1a6   :  { %v306_v37 = vmul.f32 %v682_v31, %v304_v35 }
 0x1a7   :  { %v309_v39 = vmul.f32 %v676_v15, %v307_v36 }
 0x1a8   :  { %v308_v38 = vmul.f32 %v678_v17, %v306_v37 }
 0x1aa   :  { %565 = vmatprep.mubr.f32.mxu1 %v308_v38 }
 0x1ab   :  { %566 = vmatmul.mubr.f32.vlgmr.msra.gmra.mrb[2].mxu1 %v309_v39 }
 0x27e   :  { %v567_v40 = vpop.f32.mrb[2].mxu1 }
 0x27f   :  { %v386_v41 = vmul.f32 %v567_v40, %v920_v44  ;;  %v376_v42 = vpop.f32.mrb[3].mxu1 }
 0x280   :  { %v385_v43 = vmul.f32 %v376_v42, %v910_v16 }
 0x281   :  { %388 = vst [vmem:[#allocation10 + $0x8] sm:$0xff] %v386_v41 }
 0x282   :  { %387 = vst [vmem:[#allocation10] sm:$0xff] %v385_v43 }
 0x283   :  { %782 = shalt.err (!%p779_p8)
}
 0x284   :  { %s783_s16 = scalar_lea.hbm %s951_s4, 256 }
 0x285   :  { %p784_p9 = scmp.ne.s32.totalorder %s951_s4, %s783_s16  ;;  %p787_p10 = scmp.lt.u32.totalorder %s783_s16, %s951_s4 }
 0x287   :  { %p789_p11 = pnand %p787_p10, %p784_p9 }
 0x289   :  { %792 = shalt.err (!%p789_p11)
}
 0x28a   :  { %400 = dma.vmem_to_hbm [thread:$0]  %s395_s1, 256, %s951_s4, [#allocation4], %s803_s27, %s803_s27, %s804_s28  }
 0x28b   :  { %799 = dma.done.wait [#allocation4], 256  }
 0x28c   :  { %800 = vsyncadd [#allocation4], 4294967040 }
 0x28d   :  { %404 = vsyncpa [#allocation3], 1 }
 0x28e   :  { %405 = vsyncpa [#allocation6], 1 }
 0x28f   :  { %406 = vsyncpa [#allocation9], 1 }
 0x290   :  { %407 = vsyncpa [#allocation4], 1 }

</bundles_post_ra>
